<compile_context>
chip_gen: v7x
topology: tpu7x:2x2x1
jax: 0.10.0
libtpu: 0.0.40
codegen_flags: <defaults>
</compile_context>

<pallas_src>
import jax
import jax.numpy as jnp
from jax.experimental import pallas as pl
from jax.experimental.pallas import tpu as pltpu


_SMALL_FAST_PATH_BYTES = 256 * 1024  # below this, fused XLA elementwise wins


def _swish_kernel(x_ref, o_ref):
    # x * sigmoid(x) = t * tanh(t) + t, t = x/2  (one EUP tanh + cheap VPU ops),
    # computed in the input dtype (bf16 stays bf16 on v6e/v7x).
    x = x_ref[...]
    t = jnp.asarray(0.5, dtype=x.dtype) * x
    o_ref[...] = t * jnp.tanh(t) + t


def _chip_config():
    """Return (block_bytes_per_buffer, num_tensorcores) for the local TPU."""
    kind = ""
    try:
        kind = jax.devices()[0].device_kind.lower()
    except Exception:  # defensive: never fail the wrapper on device query
        pass
    # v5e / v6e: single TensorCore; 2 MiB blocks (x4 double buffers = 8 MiB)
    # already sit at ~85% of the HBM roofline and fit the scoped-VMEM default.
    if ("v5" in kind) or ("v6" in kind):
        return 2 << 20, 1
    # v7x: ~3.2 TB/s HBM, 2 TensorCores/chip, 32 MiB scoped-VMEM default ->
    # bigger blocks keep the per-grid-step overhead <10%.
    if "7" in kind:
        return 4 << 20, 2
    return 2 << 20, 1  # unknown generation: conservative defaults


def _sublane(dtype) -> int:
    """Native sublane multiple of the dtype's packed tile (8/16/32 rows)."""
    itemsize = jnp.dtype(dtype).itemsize
    if itemsize >= 4:
        return 8
    if itemsize == 2:
        return 16
    return 32


def _swish_2d(x2: jax.Array, tm: int) -> jax.Array:
    rows, cols = x2.shape
    grid_m = pl.cdiv(rows, tm)
    return pl.pallas_call(
        _swish_kernel,
        out_shape=jax.ShapeDtypeStruct((rows, cols), x2.dtype),
        grid_spec=pltpu.PrefetchScalarGridSpec(
            num_scalar_prefetch=0,
            grid=(grid_m,),
            in_specs=[pl.BlockSpec((tm, cols), lambda i: (i, 0))],
            out_specs=pl.BlockSpec((tm, cols), lambda i: (i, 0)),
        ),
        compiler_params=pltpu.CompilerParams(
            dimension_semantics=("parallel",),
        ),
    )(x2)


def swish(x: jax.Array, *, lane_width: int = 512, block_bytes: int | None = None,
          min_kernel_bytes: int = _SMALL_FAST_PATH_BYTES) -> jax.Array:
    """Elementwise x * sigmoid(x) via a Pallas TPU kernel (matches torch Swish)."""
    orig_shape = x.shape
    n = x.size
    if n == 0:
        return x
    itemsize = jnp.dtype(x.dtype).itemsize

    # ---- small-input fast path: pallas_call fixed cost dominates tiny tensors ----
    if n * itemsize <= min_kernel_bytes or n < 128:
        return x * jax.nn.sigmoid(x)

    chip_block_bytes, num_tc = _chip_config()
    if block_bytes is None:
        block_bytes = chip_block_bytes

    flat = x.reshape(-1)

    # ---- lane-dense 2-D layout (rows, cols), cols a multiple of 128 ----
    # Prefer a cols that divides n exactly so the reshape is zero-copy
    # (no pad pass, no output-slice pass).  cols >= 128 keeps unmasked vst.
    cols = 0
    for c in (lane_width, 512, 256, 128):
        if c % 128 == 0 and n % c == 0:
            cols = c
            break

    if cols:
        main, tail = flat, None
    else:
        # Large ragged size (rare): kernel on the 128-aligned prefix, plain-jnp
        # tail (< 128 elems), instead of padding + slicing the whole tensor.
        cols = 128
        n_main = (n // cols) * cols
        main, tail = flat[:n_main], flat[n_main:]

    rows = main.size // cols
    sub = _sublane(x.dtype)

    # ---- byte-budgeted row tiling (~block_bytes per buffer) ----
    tm = block_bytes // (cols * itemsize)
    tm = max(sub, (tm // sub) * sub)
    if tm >= rows:
        tm = rows  # single full block (block == full array dims is always legal)
    grid_m = pl.cdiv(rows, tm)

    # ---- megacore sharding (v7x only: 2 TCs split the "parallel" axis) ----
    # Aim for >= 2-4 steps per core so each core can software-pipeline its DMA,
    # but never shrink a block below ~512 KiB.  On 1-TC parts the grid is a
    # serial loop, so extra splits would only add per-step overhead.
    if num_tc > 1 and rows > sub:
        target_steps = 4 * num_tc
        if grid_m < target_steps:
            min_tm = max(sub, (((512 << 10) // (cols * itemsize)) // sub) * sub)
            cand_tm = pl.cdiv(pl.cdiv(rows, target_steps), sub) * sub
            cand_tm = max(cand_tm, min_tm)
            if cand_tm < rows:
                tm = cand_tm
                grid_m = pl.cdiv(rows, tm)  # noqa: F841 (recomputed in _swish_2d)

    out_main = _swish_2d(main.reshape(rows, cols), tm).reshape(-1)

    if tail is None:
        return out_main.reshape(orig_shape)
    out_tail = tail * jax.nn.sigmoid(tail)
    return jnp.concatenate([out_main, out_tail]).reshape(orig_shape)


if __name__ == "__main__":
    key = jax.random.PRNGKey(0)
    k1, k2, k3, k4 = jax.random.split(key, 4)

    def ref_swish(v):
        return v * jax.nn.sigmoid(v)

    # 1) Module-spec-sized input (2,4,16,16): default (fast) path and the
    #    forced Pallas-kernel path must both match the reference.
    x = jax.random.normal(k1, (2, 4, 16, 16), dtype=jnp.float32)
    y_fast = swish(x)
    y_kern = swish(x, min_kernel_bytes=0)  # force the Pallas kernel path
    jax.block_until_ready((y_fast, y_kern))
    r = ref_swish(x)
    assert y_fast.shape == x.shape and y_fast.dtype == x.dtype
    assert jnp.allclose(y_fast, r, atol=1e-5, rtol=1e-5)
    assert jnp.allclose(y_kern, r, atol=1e-5, rtol=1e-5)

    # 2) Multi-block tiling: tiny block_bytes -> several grid steps.
    x2 = jax.random.normal(k2, (8, 1024), dtype=jnp.float32)
    y2 = swish(x2, min_kernel_bytes=0, block_bytes=8 * 1024)
    jax.block_until_ready(y2)
    assert jnp.allclose(y2, ref_swish(x2), atol=1e-5, rtol=1e-5)

    # 3) Ragged size (n % 128 != 0): kernel on aligned prefix + jnp tail.
    x3 = jax.random.normal(k3, (5, 7, 9), dtype=jnp.float32)
    y3 = swish(x3, min_kernel_bytes=0)
    jax.block_until_ready(y3)
    assert y3.shape == x3.shape
    assert jnp.allclose(y3, ref_swish(x3), atol=1e-5, rtol=1e-5)

    # 4) bf16 stays bf16 (native VPU/EUP tanh on v6e/v7x).
    x4 = jax.random.normal(k4, (4, 384), dtype=jnp.bfloat16)
    y4 = swish(x4, min_kernel_bytes=0)
    jax.block_until_ready(y4)
    r4 = (x4.astype(jnp.float32) * jax.nn.sigmoid(x4.astype(jnp.float32))).astype(jnp.bfloat16)
    assert y4.dtype == jnp.bfloat16
    assert jnp.allclose(y4.astype(jnp.float32), r4.astype(jnp.float32), atol=2e-2, rtol=2e-2)

    print("KERNEL_OK")
</pallas_src>

<mosaic_0001>
module attributes {stable_mosaic.version = 11 : i64} {
  func.func @_swish_kernel(%arg0: i32, %arg1: memref<4x512xf32, #tpu.memory_space<vmem>>, %arg2: memref<4x512xf32, #tpu.memory_space<vmem>>) attributes {dimension_semantics = [#tpu.dimension_semantics<parallel>], iteration_bounds = array<i64: 1>, scalar_prefetch = 0 : i64, scratch_operands = 0 : i64, tpu.core_type = #tpu.core_type<tc>, window_params = [{transform_indices = @transform_0, window_bounds = array<i64: 4, 512>}, {transform_indices = @transform_1, window_bounds = array<i64: 4, 512>}]} {
    %c0 = arith.constant 0 : index
    %c0_0 = arith.constant 0 : index
    %0 = vector.load %arg1[%c0, %c0_0] : memref<4x512xf32, #tpu.memory_space<vmem>>, vector<4x512xf32>
    %cst = arith.constant 5.000000e-01 : f32
    %1 = vector.broadcast %cst : f32 to vector<4x512xf32>
    %2 = arith.mulf %1, %0 : vector<4x512xf32>
    %3 = math.tanh %2 : vector<4x512xf32>
    %4 = arith.mulf %2, %3 : vector<4x512xf32>
    %5 = arith.addf %4, %2 : vector<4x512xf32>
    %c0_1 = arith.constant 0 : index
    %c0_2 = arith.constant 0 : index
    %6 = vector.load %arg2[%c0_1, %c0_2] : memref<4x512xf32, #tpu.memory_space<vmem>>, vector<4x512xf32>
    tpu.vector_store %arg2[%c0_1, %c0_2], %5 {strides = array<i32>} : memref<4x512xf32, #tpu.memory_space<vmem>>, vector<4x512xf32>,
    return
  }
  func.func @transform_0(%arg0: i32) -> (i32, i32) {
    %c0_i32 = arith.constant 0 : i32
    %c0_i32_0 = arith.constant 0 : i32
    return %arg0, %c0_i32 : i32, i32
  }
  func.func @transform_1(%arg0: i32) -> (i32, i32) {
    %c0_i32 = arith.constant 0 : i32
    %c0_i32_0 = arith.constant 0 : i32
    return %arg0, %c0_i32 : i32, i32
  }
}

</mosaic_0001>

<bundles_post_ra>
// kernel: tpu_custom_call.1
= control target key start
LH: loop header
LB: loop body
LE: loop exit
PB: predicated region body
PF: predicated region fallthrough
CT: control target
= control target key end

     0   :  { %6 = vsyncpa [#allocation3], 0  ;;  %s138_s0 = inlined_call_operand.hbm [shape: f32[4,512], index: 0, kind: input, shape index: {}]   ;;  %s139_s1 = inlined_call_operand.hbm [shape: f32[4,512], index: 1, kind: output, shape index: {}]  }
   0x1   :  { %7 = vsyncpa [#allocation4], 0  ;;  %s102_s6 = smov [#allocation2]   ;;  %s54_s10 = scalar_lea.hbm %s138_s0, 256 }
   0x2   :  { %s14_s7 = sshll.u32 %s102_s6, 4  ;;  %p55_p0 = scmp.ne.s32.totalorder %s138_s0, %s54_s10  ;;  %s15_s7 = int_to_ptr.vmem [resolvable:$true] %s14_s7 }
   0x3   :  { %p58_p1 = scmp.lt.u32.totalorder %s54_s10, %s138_s0 }
   0x5   :  { %p60_p2 = pnand %p58_p1, %p55_p0 }
   0x7   :  { %63 = shalt.err (!%p60_p2)
}
   0x8   :  { %s64_s15 = scalar_lea.vmem %s15_s7, 256  ;;  %p69_p4 = scmp.lt.s32.totalorder %s15_s7, %s15_s7 }
   0x9   :  { %p65_p3 = scmp.ne.s32.totalorder %s15_s7, %s64_s15  ;;  %p70_p5 = scmp.lt.s32.totalorder %s64_s15, %s64_s15 }
   0xb   :  { %p71_p6 = por %p70_p5, %p69_p4 }
   0xd   :  { %p72_p7 = pnand %p71_p6, %p65_p3 }
   0xf   :  { %75 = shalt.err (!%p72_p7)
}
  0x10   :  { %17 = dma.hbm_to_vmem [thread:$0]  %s138_s0, 256, %s15_s7, [#allocation3]  }
  0x11   :  { %98 = dma.done.wait [#allocation3], 256  }
  0x12   :  { %99 = vsyncadd [#allocation3], 4294967040  ;;  %v21_v0 = vld [vmem:[#allocation2] sm:$0xff]  ;;  %v22_v1 = vld [vmem:[#allocation2 + $0x8] sm:$0xff]  ;;  %s103_s18 = smov [#allocation5]  }
  0x13   :  { %v23_v2 = vmul.f32 0.5, %v21_v0  ;;  %v24_v3 = vmul.f32 0.5, %v22_v1  ;;  %s39_s19 = sshll.u32 %s103_s18, 4  ;;  %s40_s19 = int_to_ptr.vmem [resolvable:$true] %s39_s19 }
  0x14   :  { %s76_s0 = scalar_lea.vmem %s40_s19, 256  ;;  %p81_p9 = scmp.lt.s32.totalorder %s40_s19, %s40_s19 }
  0x15   :  { %50 = vtanh.f32 %v23_v2  ;;  %p77_p8 = scmp.ne.s32.totalorder %s40_s19, %s76_s0  ;;  %p82_p10 = scmp.lt.s32.totalorder %s76_s0, %s76_s0 }
  0x16   :  { %52 = vtanh.f32 %v24_v3 }
  0x17   :  { %p83_p11 = por %p82_p10, %p81_p9 }
  0x19   :  { %p84_p12 = pnand %p83_p11, %p77_p8 }
  0x1f   :  { %v51_v4 = vpop.eup %50 }
  0x20   :  { %v53_v5 = vpop.eup %52  ;;  %v27_v6 = vmul.f32 %v51_v4, %v23_v2 }
  0x21   :  { %v28_v7 = vmul.f32 %v53_v5, %v24_v3 }
  0x22   :  { %v29_v8 = vadd.f32 %v27_v6, %v23_v2 }
  0x23   :  { %v30_v9 = vadd.f32 %v28_v7, %v24_v3 }
  0x24   :  { %31 = vst [vmem:[#allocation5] sm:$0xff] %v29_v8 }
  0x25   :  { %32 = vst [vmem:[#allocation5 + $0x8] sm:$0xff] %v30_v9 }
  0x26   :  { %87 = shalt.err (!%p84_p12)
}
  0x27   :  { %s88_s22 = scalar_lea.hbm %s139_s1, 256 }
  0x28   :  { %p89_p13 = scmp.ne.s32.totalorder %s139_s1, %s88_s22  ;;  %p92_p0 = scmp.lt.u32.totalorder %s88_s22, %s139_s1 }
  0x2a   :  { %p94_p1 = pnand %p92_p0, %p89_p13 }
  0x2c   :  { %97 = shalt.err (!%p94_p1)
}
  0x2d   :  { %42 = dma.vmem_to_hbm [thread:$0]  %s40_s19, 256, %s139_s1, [#allocation4]  }
  0x2e   :  { %100 = dma.done.wait [#allocation4], 256  }
  0x2f   :  { %101 = vsyncadd [#allocation4], 4294967040 }
  0x30   :  { %46 = vsyncpa [#allocation3], 1 }
  0x31   :  { %47 = vsyncpa [#allocation4], 1 }

</bundles_post_ra>
